<compile_context>
chip_gen: v6e
topology: v6e:2x2x1
jax: 0.10.0
libtpu: 0.0.40
codegen_flags: <defaults>
</compile_context>

<pallas_src>
import functools

import jax
import jax.numpy as jnp
from jax.experimental import pallas as pl
from jax.experimental.pallas import tpu as pltpu


def _ce_kernel(pred_ref, tgt_ref, out_ref):
    # pred_ref: (1, C, tL) float ; tgt_ref: (1, 1, tL) int32 ; out_ref: (1, 1, tL) f32
    p = pred_ref[...].astype(jnp.float32)                 # (1, C, tL)
    t = tgt_ref[...]                                      # (1, 1, tL)

    # Numerically-stable log-sum-exp over the class (sublane) axis.
    m = jnp.max(p, axis=1, keepdims=True)                 # (1, 1, tL)
    lse = m + jnp.log(jnp.sum(jnp.exp(p - m), axis=1, keepdims=True))  # (1, 1, tL)

    # Gather the target-class logit via a one-hot select over the sublane axis.
    c_iota = jax.lax.broadcasted_iota(jnp.int32, p.shape, 1)  # (1, C, tL)
    onehot = c_iota == t                                   # broadcast along classes
    picked = jnp.sum(jnp.where(onehot, p, 0.0), axis=1, keepdims=True)  # (1, 1, tL)

    loss = lse - picked
    # PyTorch CrossEntropyLoss(reduction='none') emits 0 for ignored targets
    # (default ignore_index=-100). Treat any negative target (incl. lane padding)
    # as ignored so padded/ignored pixels contribute 0 instead of lse.
    loss = jnp.where(t >= 0, loss, 0.0)
    out_ref[...] = loss.astype(out_ref.dtype)


@functools.partial(jax.jit, static_argnames=("max_tile_l",))
def segmentation_loss(predictions, targets, *, max_tile_l=2048):
    """predictions: (N, C, H, W) float ; targets: (N, H, W) int -> loss (N, H*W) f32."""
    N, C, H, W = predictions.shape
    L = H * W

    # Native layout: no transpose, no extra HBM pass over predictions.
    pred_ncl = predictions.reshape(N, C, L)
    tgt = targets.reshape(N, 1, L).astype(jnp.int32)

    # Pick the L tile (lane axis): full extent when it fits, else the largest
    # multiple of 128 <= max_tile_l. Pad the lane axis if L doesn't divide.
    if L <= max_tile_l:
        tl = L
        l_pad = L
    else:
        tl = max(128, (max_tile_l // 128) * 128)
        l_pad = ((L + tl - 1) // tl) * tl
    if l_pad != L:
        pad = l_pad - L
        pred_ncl = jnp.pad(pred_ncl, ((0, 0), (0, 0), (0, pad)))
        # Padded pixels get target -1 -> zero loss inside the kernel.
        tgt = jnp.pad(tgt, ((0, 0), (0, 0), (0, pad)), constant_values=-1)

    grid = (N, l_pad // tl)

    out = pl.pallas_call(
        _ce_kernel,
        out_shape=jax.ShapeDtypeStruct((N, 1, l_pad), jnp.float32),
        grid_spec=pltpu.PrefetchScalarGridSpec(
            num_scalar_prefetch=0,
            grid=grid,
            in_specs=[
                pl.BlockSpec((1, C, tl), lambda n, l: (n, 0, l)),
                pl.BlockSpec((1, 1, tl), lambda n, l: (n, 0, l)),
            ],
            out_specs=pl.BlockSpec((1, 1, tl), lambda n, l: (n, 0, l)),
        ),
        compiler_params=pltpu.CompilerParams(
            # 2-D parallel grid: v7x shards both axes across its two TensorCores;
            # harmless (single TC) on v5e/v6e.
            dimension_semantics=("parallel", "parallel"),
        ),
    )(pred_ncl, tgt)

    return out[:, 0, :L]


def _reference_loss(predictions, targets):
    N, C, H, W = predictions.shape
    L = H * W
    p = predictions.reshape(N, C, L).astype(jnp.float32)
    t = targets.reshape(N, L)
    logp = jax.nn.log_softmax(p, axis=1)
    return -jnp.take_along_axis(logp, t[:, None, :], axis=1)[:, 0, :]


if __name__ == "__main__":
    key = jax.random.PRNGKey(0)
    k1, k2, k3, k4 = jax.random.split(key, 4)

    # Primary small test (matches the module's implied shapes).
    N, C, H, W = 2, 4, 16, 16
    predictions = jax.random.normal(k1, (N, C, H, W), dtype=jnp.float32)
    targets = jax.random.randint(k2, (N, H, W), 0, C, dtype=jnp.int32)

    loss = segmentation_loss(predictions, targets)
    loss = jax.block_until_ready(loss)
    ref = _reference_loss(predictions, targets)
    assert loss.shape == (N, H * W)
    assert jnp.allclose(loss, ref, atol=1e-5, rtol=1e-5), "mismatch vs reference"

    # Secondary test: non-divisible L exercises the multi-tile + padded-tail path.
    N2, C2, H2, W2 = 2, 5, 30, 30  # L = 900, tiled at 512 -> pad to 1024
    pred2 = jax.random.normal(k3, (N2, C2, H2, W2), dtype=jnp.float32)
    tgt2 = jax.random.randint(k4, (N2, H2, W2), 0, C2, dtype=jnp.int32)
    loss2 = jax.block_until_ready(segmentation_loss(pred2, tgt2, max_tile_l=512))
    ref2 = _reference_loss(pred2, tgt2)
    assert loss2.shape == (N2, H2 * W2)
    assert jnp.allclose(loss2, ref2, atol=1e-5, rtol=1e-5), "mismatch vs reference (tiled)"

    print("KERNEL_OK")
</pallas_src>

<mosaic_0001>
module attributes {stable_mosaic.version = 11 : i64} {
  func.func @_ce_kernel(%arg0: i32, %arg1: i32, %arg2: memref<1x4x256xf32, #tpu.memory_space<vmem>>, %arg3: memref<1x1x256xi32, #tpu.memory_space<vmem>>, %arg4: memref<1x1x256xf32, #tpu.memory_space<vmem>>) attributes {dimension_semantics = [#tpu.dimension_semantics<parallel>, #tpu.dimension_semantics<parallel>], iteration_bounds = array<i64: 2, 1>, scalar_prefetch = 0 : i64, scratch_operands = 0 : i64, tpu.core_type = #tpu.core_type<tc>, window_params = [{transform_indices = @transform_0, window_bounds = array<i64: 1, 4, 256>}, {transform_indices = @transform_1, window_bounds = array<i64: 1, 1, 256>}, {transform_indices = @transform_2, window_bounds = array<i64: 1, 1, 256>}]} {
    %c0 = arith.constant 0 : index
    %c0_0 = arith.constant 0 : index
    %c0_1 = arith.constant 0 : index
    %0 = vector.load %arg2[%c0, %c0_0, %c0_1] : memref<1x4x256xf32, #tpu.memory_space<vmem>>, vector<1x4x256xf32>
    %c0_2 = arith.constant 0 : index
    %c0_3 = arith.constant 0 : index
    %c0_4 = arith.constant 0 : index
    %1 = vector.load %arg3[%c0_2, %c0_3, %c0_4] : memref<1x1x256xi32, #tpu.memory_space<vmem>>, vector<1x1x256xi32>
    %cst = arith.constant dense<0xFF800000> : vector<1x256xf32>
    %2 = vector.multi_reduction <maximumf>, %0, %cst [1] : vector<1x4x256xf32> to vector<1x256xf32>
    %3 = vector.shape_cast %2 : vector<1x256xf32> to vector<1x1x256xf32>
    %4 = vector.broadcast %3 : vector<1x1x256xf32> to vector<1x4x256xf32>
    %5 = arith.subf %0, %4 : vector<1x4x256xf32>
    %6 = math.exp %5 : vector<1x4x256xf32>
    %cst_5 = arith.constant dense<0.000000e+00> : vector<1x256xf32>
    %7 = vector.multi_reduction <add>, %6, %cst_5 [1] : vector<1x4x256xf32> to vector<1x256xf32>
    %8 = vector.shape_cast %7 : vector<1x256xf32> to vector<1x1x256xf32>
    %9 = math.log %8 : vector<1x1x256xf32>
    %10 = arith.addf %3, %9 : vector<1x1x256xf32>
    %11 = tpu.iota {dimensions = array<i32: 1>} : vector<1x4x256xi32>
    %12 = vector.broadcast %1 : vector<1x1x256xi32> to vector<1x4x256xi32>
    %13 = arith.cmpi eq, %11, %12 : vector<1x4x256xi32>
    %cst_6 = arith.constant 0.000000e+00 : f32
    %14 = vector.broadcast %cst_6 : f32 to vector<1x4x256xf32>
    %15 = arith.select %13, %0, %14 : vector<1x4x256xi1>, vector<1x4x256xf32>
    %cst_7 = arith.constant dense<0.000000e+00> : vector<1x256xf32>
    %16 = vector.multi_reduction <add>, %15, %cst_7 [1] : vector<1x4x256xf32> to vector<1x256xf32>
    %17 = vector.shape_cast %16 : vector<1x256xf32> to vector<1x1x256xf32>
    %18 = arith.subf %10, %17 : vector<1x1x256xf32>
    %c0_i32 = arith.constant 0 : i32
    %19 = vector.broadcast %c0_i32 : i32 to vector<1x1x256xi32>
    %20 = arith.cmpi sge, %1, %19 : vector<1x1x256xi32>
    %cst_8 = arith.constant 0.000000e+00 : f32
    %21 = vector.broadcast %cst_8 : f32 to vector<1x1x256xf32>
    %22 = arith.select %20, %18, %21 : vector<1x1x256xi1>, vector<1x1x256xf32>
    %c0_9 = arith.constant 0 : index
    %c0_10 = arith.constant 0 : index
    %c0_11 = arith.constant 0 : index
    %23 = vector.load %arg4[%c0_9, %c0_10, %c0_11] : memref<1x1x256xf32, #tpu.memory_space<vmem>>, vector<1x1x256xf32>
    tpu.vector_store %arg4[%c0_9, %c0_10, %c0_11], %22 {strides = array<i32>} : memref<1x1x256xf32, #tpu.memory_space<vmem>>, vector<1x1x256xf32>,
    return
  }
  func.func @transform_0(%arg0: i32, %arg1: i32) -> (i32, i32, i32) {
    %c0_i32 = arith.constant 0 : i32
    %c0_i32_0 = arith.constant 0 : i32
    return %arg0, %c0_i32, %arg1 : i32, i32, i32
  }
  func.func @transform_1(%arg0: i32, %arg1: i32) -> (i32, i32, i32) {
    %c0_i32 = arith.constant 0 : i32
    %c0_i32_0 = arith.constant 0 : i32
    return %arg0, %c0_i32, %arg1 : i32, i32, i32
  }
  func.func @transform_2(%arg0: i32, %arg1: i32) -> (i32, i32, i32) {
    %c0_i32 = arith.constant 0 : i32
    %c0_i32_0 = arith.constant 0 : i32
    return %arg0, %c0_i32, %arg1 : i32, i32, i32
  }
}

</mosaic_0001>

<bundles_post_ra>
// kernel: segmentation_loss.1
= control target key start
LH: loop header
LB: loop body
LE: loop exit
PB: predicated region body
PF: predicated region fallthrough
CT: control target
= control target key end

     0   :  { %s499_s9 = smov 0   ;;  %s501_s10 = smov 0   ;;  %s551_s0 = inlined_call_operand.vmem [shape: f32[2,4,256], index: 0, kind: input, shape index: {}]   ;;  %s552_s1 = inlined_call_operand.vmem [shape: s32[2,1,256], index: 1, kind: input, shape index: {}]   ;;  %s553_s2 = inlined_call_operand.vmem [shape: f32[2,1,256], index: 2, kind: output, shape index: {}]  }
   0x1   :  { %s503_s11 = smov 0  }
   0x2 LB: > { %s24_s12 = sadd.s32 1, %s477_s10  ;;  %p419_p0 = scmp.ge.s32.totalorder %s481_s11, 1  ;;  %s481_s11 = sphi %s503_s11, %s12_s11   ;;  %s477_s10 = sphi %s501_s10, %s555_s10   ;;  %s473_s9 = sphi %s499_s9, %s554_s9  }
   0x3   : > { %p26_p1 = scmp.ge.s32.totalorder %s24_s12, 2  ;;  %p149_p2 = scmp.lt.s32.totalorder %s481_s11, 3 }
   0x5   : > { %s557_s12 = smov (%p26_p1, %s24_s12), 0  ;;  %p150_p3 = pnand %p419_p0, %p149_p2 }
   0x6   : > { %p187_p4 = scmp.lt.s32.totalorder (!%p150_p3), %s473_s9, 1 }
   0x7   : > { %153 = sbr.rel (%p150_p3) target bundleno = 94 (0x5e), region = 28 }
   0xc   : > { %s559_s9 = smov (!%p187_p4, %s473_s9), 1  ;;  %vm219_vm0 = vcmask 1043456   ;;  %v264_v18 = vlaneseq  ;;  %v483_v56 = vmov 1966171168  }
   0xd   : > { %s426_s13 = sshll.u32 %s559_s9, 3  ;;  %s422_s17 = sshll.u32 %s559_s9, 1  ;;  %v299_v57 = vunpack.c.l.s4 %v483_v56 }
   0xe   : > { %s194_s16 = scalar_lea.vmem %s551_s0, %s426_s13  ;;  %v265_v20 = vshrl.u32 %v264_v18, 7  ;;  %s203_s20 = scalar_lea.vmem %s552_s1, %s422_s17  ;;  %vm316_vm4 = vcmp.lt.s32.totalorder %v264_v18, 256 }
   0xf   : > { %v214_v0 = vld [vmem:[%s194_s16] sm:$0xff]  ;;  %s212_s23 = scalar_lea.vmem %s553_s2, %s422_s17 }
  0x10   : > { %v217_v1 = vcombine.high %v214_v0, %v214_v0  ;;  %v220_v2 = vsel %vm219_vm0, %v214_v0, -inf  ;;  %v268_v21 = vsub.s32 0, %v265_v20  ;;  %v215_v22 = vld [vmem:[%s203_s20] sm:$0x3]  ;;  %v272_v23 = vsub.s32 1, %v265_v20 }
  0x11   : > { %v221_v3 = vrot.slane %v220_v2, 4  ;;  %vm294_vm3 = vcmp.ge.s32.totalorder %v215_v22, 0 }
  0x12   : > { %v227_v4 = vsel %vm219_vm0, %v217_v1, -inf  ;;  %v269_v24 = vrot.slane %v215_v22, %v268_v21  ;;  %v273_v25 = vrot.slane %v215_v22, %v272_v23 }
  0x13   : > { %v222_v5 = vmax.f32 %v220_v2, %v221_v3  ;;  %v228_v6 = vrot.slane %v227_v4, 4 }
  0x14   : > { %vm274_vm1 = vcmp.eq.s32.totalorder %v265_v20, %v269_v24  ;;  %vm275_vm2 = vcmp.eq.s32.totalorder %v265_v20, %v273_v25 }
  0x15   : > { %v223_v7 = vrot.slane %v222_v5, 2  ;;  %v229_v8 = vmax.f32 %v227_v4, %v228_v6  ;;  %v276_v30 = vsel %vm274_vm1, %v214_v0, 0.0  ;;  %v277_v34 = vsel %vm275_vm2, %v217_v1, 0.0 }
  0x16   : > { %v278_v35 = vsel %vm219_vm0, %v276_v30, 0.0  ;;  %v285_v38 = vsel %vm219_vm0, %v277_v34, 0.0  ;;  %v300_v1 = vunpack.c.0.s8 %v299_v57 }
  0x17   : > { %v224_v9 = vmax.f32 %v222_v5, %v223_v7  ;;  %v230_v10 = vrot.slane %v229_v8, 2  ;;  %v279_v41 = vrot.slane %v278_v35, 4  ;;  %v286_v44 = vrot.slane %v285_v38, 4 }
  0x18   : > { %v303_v5 = vsub.s32 %v300_v1, %v265_v20 }
  0x19   : > { %v225_v11 = vrot.slane %v224_v9, 1  ;;  %v231_v12 = vmax.f32 %v229_v8, %v230_v10  ;;  %v280_v47 = vadd.f32 %v279_v41, %v278_v35  ;;  %v287_v49 = vadd.f32 %v286_v44, %v285_v38 }
  0x1b   : > { %v226_v13 = vmax.f32 %v224_v9, %v225_v11  ;;  %v232_v14 = vrot.slane %v231_v12, 1  ;;  %v281_v50 = vrot.slane %v280_v47, 2  ;;  %v288_v51 = vrot.slane %v287_v49, 2 }
  0x1d   : > { %v233_v15 = vmax.f32 %v231_v12, %v232_v14  ;;  %v282_v52 = vadd.f32 %v281_v50, %v280_v47  ;;  %v289_v53 = vadd.f32 %v288_v51, %v287_v49 }
  0x1f   : > { %v236_v16 = vcombine.low %v226_v13, %v233_v15  ;;  %v283_v54 = vrot.slane %v282_v52, 1  ;;  %v290_v55 = vrot.slane %v289_v53, 1 }
  0x21   : > { %v238_v17 = vsub.f32 %v214_v0, %v236_v16  ;;  %v284_v60 = vadd.f32 %v283_v54, %v282_v52  ;;  %v291_v0 = vadd.f32 %v290_v55, %v289_v53 }
  0x23   : > { %v239_v19 = vmul.f32 1.442695, %v238_v17 }
  0x25   : > { %453 = vpow2.f32 %v239_v19 }
  0x32   : > { %v454_v26 = vpop.eup %453 }
  0x33   : > { %v242_v27 = vcombine.high %v454_v26, %v454_v26  ;;  %v244_v28 = vsel %vm219_vm0, %v454_v26, 0.0 }
  0x34   : > { %v245_v29 = vrot.slane %v244_v28, 4 }
  0x35   : > { %v251_v31 = vsel %vm219_vm0, %v242_v27, 0.0 }
  0x36   : > { %v246_v32 = vadd.f32 %v245_v29, %v244_v28  ;;  %v252_v33 = vrot.slane %v251_v31, 4 }
  0x38   : > { %v247_v36 = vrot.slane %v246_v32, 2  ;;  %v253_v37 = vadd.f32 %v252_v33, %v251_v31 }
  0x3a   : > { %v248_v39 = vadd.f32 %v247_v36, %v246_v32  ;;  %v254_v40 = vrot.slane %v253_v37, 2 }
  0x3c   : > { %v249_v42 = vrot.slane %v248_v39, 1  ;;  %v255_v43 = vadd.f32 %v254_v40, %v253_v37 }
  0x3e   : > { %v250_v45 = vadd.f32 %v249_v42, %v248_v39  ;;  %v256_v46 = vrot.slane %v255_v43, 1 }
  0x40   : > { %v257_v48 = vadd.f32 %v256_v46, %v255_v43  ;;  %455 = vlog2.f32 %v250_v45 }
  0x42   : > { %457 = vlog2.f32 %v257_v48 }
  0x4d   : > { %v456_v58 = vpop.eup %455 }
  0x4e   : > { %v259_v59 = vmul.f32 0.6931472, %v456_v58 }
  0x4f   : > { %v458_v61 = vpop.eup %457 }
  0x50   : > { %v261_v62 = vmul.f32 0.6931472, %v458_v61  ;;  %v262_v63 = vadd.f32 %v259_v59, %v226_v13 }
  0x52   : > { %v263_v2 = vadd.f32 %v261_v62, %v233_v15  ;;  %v292_v3 = vsub.f32 %v262_v63, %v284_v60 }
  0x54   : > { %v293_v4 = vsub.f32 %v263_v2, %v291_v0 }
  0x56   : > { %v297_v6 = vcombine.low %v292_v3, %v293_v4 }
  0x58   : > { %v304_v7 = vrot.slane %v297_v6, %v303_v5 }
  0x5a   : > { %v311_v8 = vrot.slane %v304_v7, %v303_v5 }
  0x5c   : > { %v313_v9 = vsel %vm294_vm3, %v311_v8, 0.0 }
  0x5d   : > { %318 = vst.msk [vmem:[%s212_s23] sm:$0x3] %vm316_vm4, %v313_v9 }
  0x5e PF: > { %s12_s11 = sadd.s32 1, %s481_s11   ;;  %s554_s9 = smov %s477_s10 }
  0x5f   : > { %p9_p5 = scmp.ge.s32.totalorder %s12_s11, 4   ;;  %s555_s10 = smov %s557_s12 }
  0x61   :  { %11 = sbr.rel (!%p9_p5) target bundleno = 2 (0x2), region = 61 }

</bundles_post_ra>
